<compile_context>
chip_gen: v7x
topology: tpu7x:2x2x1
jax: 0.10.0
libtpu: 0.0.40
codegen_flags: <defaults>
</compile_context>

<pallas_src>
import functools

import jax
import jax.numpy as jnp
from jax.experimental import pallas as pl
from jax.experimental.pallas import tpu as pltpu

BN_EPS = 1e-5


def _nbytes(shape, dtype):
    n = 1
    for d in shape:
        n *= int(d)
    return n * jnp.dtype(dtype).itemsize


def _linear_bn(h, w_ref, bn_ref, *, relu):
    """Linear (bias-free) -> BatchNorm1d (training-mode batch stats) -> ReLU?

    h:      (B, K) value -- full batch (required for correct batch stats).
    w_ref:  (K, N) bf16 weight ref (pre-transposed in the wrapper).
    bn_ref: (2, N) f32 ref; row 0 = gamma, row 1 = beta.
    """
    w = w_ref[...]
    # bf16 x bf16 -> f32 accumulate: native MXU rate. (.astype is a no-op when
    # h is already bf16, e.g. the cached hidden activation.)
    y = jnp.dot(h.astype(w.dtype), w, preferred_element_type=jnp.float32)
    # Linear bias intentionally omitted: BN's mean subtraction cancels it.
    bn = bn_ref[...]
    gamma, beta = bn[0:1, :], bn[1:2, :]
    mean = jnp.mean(y, axis=0, keepdims=True)
    yc = y - mean                                   # centered once, reused
    var = jnp.mean(yc * yc, axis=0, keepdims=True)  # biased var (PyTorch train)
    scale = jax.lax.rsqrt(var + BN_EPS) * gamma     # gamma folded: (1, N) op
    out = yc * scale + beta
    if relu:
        out = jnp.maximum(out, 0.0)
    return out


def _fused_mlp_kernel(*refs, num_layers):
    if num_layers == 3:
        (x_ref, w1_ref, bn1_ref, w2_ref, bn2_ref, w3_ref, bn3_ref,
         o_ref, h_ref) = refs
    else:  # num_layers == 2
        (x_ref, w1_ref, bn1_ref, w3_ref, bn3_ref, o_ref, h_ref) = refs
        w2_ref = bn2_ref = None

    # Layers 1 (and 2) need every output feature, so compute them once on grid
    # step 0 and cache the (B, hidden) activation in bf16 VMEM scratch
    # (scratch persists across grid steps; the grid axis is "arbitrary").
    @pl.when(pl.program_id(0) == 0)
    def _():
        h = _linear_bn(x_ref[...], w1_ref, bn1_ref, relu=True)
        if num_layers == 3:
            h = _linear_bn(h, w2_ref, bn2_ref, relu=True)
        h_ref[...] = h.astype(h_ref.dtype)

    # Layer 3: this grid step's lane-dense output-feature tile.
    o_ref[...] = _linear_bn(h_ref[...], w3_ref, bn3_ref,
                            relu=False).astype(o_ref.dtype)


def _vmem_capacity_bytes():
    """Physical VMEM per core; 64 MiB fallback is safe on every generation."""
    try:
        cap = int(getattr(pltpu.get_tpu_info(), "vmem_capacity_bytes", 0))
        if cap > 0:
            return cap
    except Exception:
        pass
    return 64 * 1024 * 1024


def _vmem_estimate(B, in_dim, hidden, tn, num_layers,
                   x_dtype, w_dtype, out_dtype, const_bufs):
    const = (_nbytes((B, in_dim), x_dtype)
             + _nbytes((in_dim, hidden), w_dtype)
             + _nbytes((2, hidden), jnp.float32))
    if num_layers == 3:
        const += (_nbytes((hidden, hidden), w_dtype)
                  + _nbytes((2, hidden), jnp.float32))
    per_step = (_nbytes((hidden, tn), w_dtype)
                + _nbytes((2, tn), jnp.float32)
                + _nbytes((B, tn), out_dtype))
    scratch = _nbytes((B, hidden), jnp.bfloat16)
    return const_bufs * const + 2 * per_step + scratch


def projection_mlp_forward(kparams, x, num_layers=3, out_dtype=jnp.float32,
                           single_buffer_constants=True):
    """Fused forward equivalent to projection_MLP.forward (training-mode BN)."""
    B, in_dim = x.shape
    w1, bn1 = kparams["layer1"]
    w3, bn3 = kparams["layer3"]
    hidden = w1.shape[1]
    out_dim = w3.shape[1]
    w_dtype = w1.dtype

    assert w1.shape[0] == in_dim
    assert w3.shape[0] == hidden
    # PyTorch's layer3 applies BatchNorm1d(hidden_dim) to an out_dim-wide
    # output; that only works when hidden_dim == out_dim.
    assert bn3.shape[1] == out_dim, "layer3 BN requires hidden_dim == out_dim"

    if single_buffer_constants and not hasattr(pl, "Buffered"):
        single_buffer_constants = False
    const_bufs = 1 if single_buffer_constants else 2

    # --- generation/VMEM-aware layer-3 feature tile ------------------------
    cap = _vmem_capacity_bytes()
    budget = int(cap * 0.8)
    if out_dim % 128 == 0:
        tn = out_dim
        while True:
            est = _vmem_estimate(B, in_dim, hidden, tn, num_layers,
                                 x.dtype, w_dtype, out_dtype, const_bufs)
            half = tn // 2
            if est <= budget or half < 128 or half % 128 != 0:
                break
            tn = half
    else:
        # Not lane-aligned: a single full-width block is still legal (block
        # equals the full array dim).
        tn = out_dim
        est = _vmem_estimate(B, in_dim, hidden, tn, num_layers,
                             x.dtype, w_dtype, out_dtype, const_bufs)
    assert out_dim % tn == 0

    # --- BlockSpecs ---------------------------------------------------------
    def const_spec(shape):
        # Constant-index inputs: their block never changes across the grid, so
        # request a single pipeline buffer (double-buffering is VMEM waste).
        if single_buffer_constants:
            try:
                return pl.BlockSpec(shape, lambda j: (0, 0),
                                    pipeline_mode=pl.Buffered(1))
            except TypeError:
                pass
        return pl.BlockSpec(shape, lambda j: (0, 0))

    if num_layers == 3:
        w2, bn2 = kparams["layer2"]
        assert w2.shape == (hidden, hidden)
        operands = (x, w1, bn1, w2, bn2, w3, bn3)
        in_specs = [
            const_spec((B, in_dim)),                        # full batch, full K
            const_spec((in_dim, hidden)),                   # W1 (bf16)
            const_spec((2, hidden)),                        # gamma/beta 1
            const_spec((hidden, hidden)),                   # W2 (bf16)
            const_spec((2, hidden)),                        # gamma/beta 2
            pl.BlockSpec((hidden, tn), lambda j: (0, j)),   # W3 tile (bf16)
            pl.BlockSpec((2, tn), lambda j: (0, j)),        # gamma/beta 3 tile
        ]
    elif num_layers == 2:
        operands = (x, w1, bn1, w3, bn3)
        in_specs = [
            const_spec((B, in_dim)),
            const_spec((in_dim, hidden)),
            const_spec((2, hidden)),
            pl.BlockSpec((hidden, tn), lambda j: (0, j)),
            pl.BlockSpec((2, tn), lambda j: (0, j)),
        ]
    else:
        raise Exception("num_layers must be 2 or 3")

    # --- compiler params ------------------------------------------------------
    # The grid axis MUST be "arbitrary": layers 1-2 run only on step 0 and
    # their result is carried in scratch across steps.
    cp_kwargs = dict(dimension_semantics=("arbitrary",))
    want = int(est * 1.5)
    if want > 16 * 1024 * 1024:  # only override the default scoped limit if needed
        cp_kwargs["vmem_limit_bytes"] = min(want, cap - (1 << 20))

    kernel = functools.partial(_fused_mlp_kernel, num_layers=num_layers)
    call = pl.pallas_call(
        kernel,
        out_shape=jax.ShapeDtypeStruct((B, out_dim), out_dtype),
        grid_spec=pltpu.PrefetchScalarGridSpec(
            num_scalar_prefetch=0,
            grid=(out_dim // tn,),
            in_specs=in_specs,
            out_specs=pl.BlockSpec((B, tn), lambda j: (0, j)),
            scratch_shapes=[pltpu.VMEM((B, hidden), jnp.bfloat16)],
        ),
        compiler_params=pltpu.CompilerParams(**cp_kwargs),
    )

    try:
        return call(*operands)
    except Exception:
        if not single_buffer_constants:
            raise
        # This Pallas build rejected pl.Buffered(1); rerun with the default
        # double-buffered pipeline (identical numerics, slightly more VMEM).
        return projection_mlp_forward(kparams, x, num_layers=num_layers,
                                      out_dtype=out_dtype,
                                      single_buffer_constants=False)


def init_params(key, in_dim, hidden_dim, out_dim):
    """Deterministic synthetic parameters in PyTorch layout (W: (out, in))."""
    ks = jax.random.split(key, 6)

    def linear(kw, kb, fan_in, fan_out):
        bound = 1.0 / jnp.sqrt(fan_in)
        w = jax.random.uniform(kw, (fan_out, fan_in), jnp.float32, -bound, bound)
        b = jax.random.uniform(kb, (fan_out,), jnp.float32, -bound, bound)
        return w, b

    w1, b1 = linear(ks[0], ks[1], in_dim, hidden_dim)
    w2, b2 = linear(ks[2], ks[3], hidden_dim, hidden_dim)
    w3, b3 = linear(ks[4], ks[5], hidden_dim, out_dim)

    def bn(dim):
        return jnp.ones((dim,), jnp.float32), jnp.zeros((dim,), jnp.float32)

    g1, be1 = bn(hidden_dim)
    g2, be2 = bn(hidden_dim)
    g3, be3 = bn(hidden_dim)   # BatchNorm1d(hidden_dim) in layer3, as in PyTorch

    return {
        "layer1": (w1, b1, g1, be1),
        "layer2": (w2, b2, g2, be2),
        "layer3": (w3, b3, g3, be3),
    }


def prepare_params(params):
    """One-time conversion of PyTorch-layout params into kernel layout.

    * weights transposed to (in, out) ONCE and cast to bf16,
    * gamma/beta stacked into one (2, N) array (one DMA instead of two),
    * linear biases dropped (exactly cancelled by training-mode BatchNorm).
    """
    out = {}
    for name in ("layer1", "layer2", "layer3"):
        w, _b, g, be = params[name]
        out[name] = (jnp.asarray(w.T, jnp.bfloat16),
                     jnp.stack([g, be]).astype(jnp.float32))
    return out


def reference_forward(params, kparams, x, num_layers=3):
    """Pure-JAX reference: identical bf16-weight matmul numerics as the kernel,
    but WITH the PyTorch linear bias (to confirm BN cancels it)."""
    def run(name, h, relu):
        _w, b, g, be = params[name]
        w_t = kparams[name][0]               # same bf16, pre-transposed weights
        y = jnp.dot(h.astype(w_t.dtype), w_t,
                    preferred_element_type=jnp.float32) + b
        mean = jnp.mean(y, axis=0, keepdims=True)
        var = jnp.mean((y - mean) ** 2, axis=0, keepdims=True)
        y = (y - mean) * jax.lax.rsqrt(var + BN_EPS) * g + be
        return jnp.maximum(y, 0.0) if relu else y

    if num_layers == 3:
        h = run("layer1", x, True)
        h = run("layer2", h, True)
        h = run("layer3", h, False)
    else:
        h = run("layer1", x, True)
        h = run("layer3", h, False)
    return h


if __name__ == "__main__":
    # Small shapes: batch=8 (sublane-aligned), in_dim=64, hidden=out=128.
    # At real SimSiam scale (B=512, hidden=out=2048) the same code path picks
    # a wider tile on v5e/v6e and shrinks it for v7x's 64 MiB VMEM.
    B, IN_DIM, HIDDEN, OUT = 8, 64, 128, 128

    key = jax.random.PRNGKey(0)
    k_x, k_p = jax.random.split(key)
    x = jax.random.normal(k_x, (B, IN_DIM), jnp.float32)
    params = init_params(k_p, IN_DIM, HIDDEN, OUT)
    kparams = prepare_params(params)

    out = jax.block_until_ready(projection_mlp_forward(kparams, x, num_layers=3))
    ref = reference_forward(params, kparams, x, num_layers=3)
    assert out.shape == (B, OUT), out.shape
    assert jnp.allclose(out, ref, atol=2e-2, rtol=2e-2), \
        "mismatch vs reference (3 layers)"

    # Also exercise the set_layers(2) path of the PyTorch module.
    out2 = jax.block_until_ready(projection_mlp_forward(kparams, x, num_layers=2))
    ref2 = reference_forward(params, kparams, x, num_layers=2)
    assert jnp.allclose(out2, ref2, atol=2e-2, rtol=2e-2), \
        "mismatch vs reference (2 layers)"

    print("KERNEL_OK")
</pallas_src>

<mosaic_0001>
module attributes {stable_mosaic.version = 11 : i64} {
  func.func @_fused_mlp_kernel(%arg0: i32, %arg1: memref<8x64xf32, #tpu.memory_space<vmem>>, %arg2: memref<64x128xbf16, #tpu.memory_space<vmem>>, %arg3: memref<2x128xf32, #tpu.memory_space<vmem>>, %arg4: memref<128x128xbf16, #tpu.memory_space<vmem>>, %arg5: memref<2x128xf32, #tpu.memory_space<vmem>>, %arg6: memref<128x128xbf16, #tpu.memory_space<vmem>>, %arg7: memref<2x128xf32, #tpu.memory_space<vmem>>, %arg8: memref<8x128xf32, #tpu.memory_space<vmem>>, %arg9: memref<8x128xbf16, #tpu.memory_space<vmem>>) attributes {dimension_semantics = [#tpu.dimension_semantics<arbitrary>], iteration_bounds = array<i64: 1>, scalar_prefetch = 0 : i64, scratch_operands = 1 : i64, tpu.core_type = #tpu.core_type<tc>, window_params = [{pipeline_mode = #tpu.pipeline_mode<synchronous>, transform_indices = @transform_0, window_bounds = array<i64: 8, 64>}, {pipeline_mode = #tpu.pipeline_mode<synchronous>, transform_indices = @transform_1, window_bounds = array<i64: 64, 128>}, {pipeline_mode = #tpu.pipeline_mode<synchronous>, transform_indices = @transform_2, window_bounds = array<i64: 2, 128>}, {pipeline_mode = #tpu.pipeline_mode<synchronous>, transform_indices = @transform_3, window_bounds = array<i64: 128, 128>}, {pipeline_mode = #tpu.pipeline_mode<synchronous>, transform_indices = @transform_4, window_bounds = array<i64: 2, 128>}, {transform_indices = @transform_5, window_bounds = array<i64: 128, 128>}, {transform_indices = @transform_6, window_bounds = array<i64: 2, 128>}, {transform_indices = @transform_7, window_bounds = array<i64: 8, 128>}]} {
    %c0_i32 = arith.constant 0 : i32
    %0 = arith.cmpi eq, %arg0, %c0_i32 : i32
    %1 = arith.extui %0 : i1 to i32
    %c0_i32_0 = arith.constant 0 : i32
    %2 = arith.cmpi ne, %1, %c0_i32_0 : i32
    scf.if %2 {
      %c0_13 = arith.constant 0 : index
      %c0_14 = arith.constant 0 : index
      %29 = vector.load %arg1[%c0_13, %c0_14] : memref<8x64xf32, #tpu.memory_space<vmem>>, vector<8x64xf32>
      %c0_15 = arith.constant 0 : index
      %c0_16 = arith.constant 0 : index
      %30 = vector.load %arg2[%c0_15, %c0_16] : memref<64x128xbf16, #tpu.memory_space<vmem>>, vector<64x128xbf16>
      %31 = arith.truncf %29 : vector<8x64xf32> to vector<8x64xbf16>
      %cst_17 = arith.constant dense<0.000000e+00> : vector<8x128xf32>
      %32 = tpu.matmul %31, %30, %cst_17 {dimension_numbers = #tpu.dot_dimension_numbers<[1], [0], [0], [1], [0, 0, 1, 1], [], []>} : vector<8x64xbf16>, vector<64x128xbf16>, vector<8x128xf32> -> vector<8x128xf32>
      %c0_18 = arith.constant 0 : index
      %c0_19 = arith.constant 0 : index
      %33 = vector.load %arg3[%c0_18, %c0_19] : memref<2x128xf32, #tpu.memory_space<vmem>>, vector<2x128xf32>
      %34 = vector.extract_strided_slice %33 {offsets = [0, 0], sizes = [1, 128], strides = [1, 1]} : vector<2x128xf32> to vector<1x128xf32>
      %35 = vector.extract_strided_slice %33 {offsets = [1, 0], sizes = [1, 128], strides = [1, 1]} : vector<2x128xf32> to vector<1x128xf32>
      %cst_20 = arith.constant dense<0.000000e+00> : vector<128xf32>
      %36 = vector.multi_reduction <add>, %32, %cst_20 [0] : vector<8x128xf32> to vector<128xf32>
      %37 = vector.shape_cast %36 : vector<128xf32> to vector<1x128xf32>
      %cst_21 = arith.constant 8.000000e+00 : f32
      %38 = vector.broadcast %cst_21 : f32 to vector<1x128xf32>
      %39 = arith.divf %37, %38 : vector<1x128xf32>
      %40 = vector.broadcast %39 : vector<1x128xf32> to vector<8x128xf32>
      %41 = arith.subf %32, %40 : vector<8x128xf32>
      %42 = arith.mulf %41, %41 : vector<8x128xf32>
      %cst_22 = arith.constant dense<0.000000e+00> : vector<128xf32>
      %43 = vector.multi_reduction <add>, %42, %cst_22 [0] : vector<8x128xf32> to vector<128xf32>
      %44 = vector.shape_cast %43 : vector<128xf32> to vector<1x128xf32>
      %cst_23 = arith.constant 8.000000e+00 : f32
      %45 = vector.broadcast %cst_23 : f32 to vector<1x128xf32>
      %46 = arith.divf %44, %45 : vector<1x128xf32>
      %cst_24 = arith.constant 9.99999974E-6 : f32
      %47 = vector.broadcast %cst_24 : f32 to vector<1x128xf32>
      %48 = arith.addf %46, %47 : vector<1x128xf32>
      %49 = math.rsqrt %48 : vector<1x128xf32>
      %50 = arith.mulf %49, %34 : vector<1x128xf32>
      %51 = vector.broadcast %50 : vector<1x128xf32> to vector<8x128xf32>
      %52 = arith.mulf %41, %51 : vector<8x128xf32>
      %53 = vector.broadcast %35 : vector<1x128xf32> to vector<8x128xf32>
      %54 = arith.addf %52, %53 : vector<8x128xf32>
      %cst_25 = arith.constant 0.000000e+00 : f32
      %55 = vector.broadcast %cst_25 : f32 to vector<8x128xf32>
      %56 = arith.maximumf %54, %55 : vector<8x128xf32>
      %c0_26 = arith.constant 0 : index
      %c0_27 = arith.constant 0 : index
      %57 = vector.load %arg4[%c0_26, %c0_27] : memref<128x128xbf16, #tpu.memory_space<vmem>>, vector<128x128xbf16>
      %58 = arith.truncf %56 : vector<8x128xf32> to vector<8x128xbf16>
      %cst_28 = arith.constant dense<0.000000e+00> : vector<8x128xf32>
      %59 = tpu.matmul %58, %57, %cst_28 {dimension_numbers = #tpu.dot_dimension_numbers<[1], [0], [0], [1], [0, 0, 1, 1], [], []>} : vector<8x128xbf16>, vector<128x128xbf16>, vector<8x128xf32> -> vector<8x128xf32>
      %c0_29 = arith.constant 0 : index
      %c0_30 = arith.constant 0 : index
      %60 = vector.load %arg5[%c0_29, %c0_30] : memref<2x128xf32, #tpu.memory_space<vmem>>, vector<2x128xf32>
      %61 = vector.extract_strided_slice %60 {offsets = [0, 0], sizes = [1, 128], strides = [1, 1]} : vector<2x128xf32> to vector<1x128xf32>
      %62 = vector.extract_strided_slice %60 {offsets = [1, 0], sizes = [1, 128], strides = [1, 1]} : vector<2x128xf32> to vector<1x128xf32>
      %cst_31 = arith.constant dense<0.000000e+00> : vector<128xf32>
      %63 = vector.multi_reduction <add>, %59, %cst_31 [0] : vector<8x128xf32> to vector<128xf32>
      %64 = vector.shape_cast %63 : vector<128xf32> to vector<1x128xf32>
      %cst_32 = arith.constant 8.000000e+00 : f32
      %65 = vector.broadcast %cst_32 : f32 to vector<1x128xf32>
      %66 = arith.divf %64, %65 : vector<1x128xf32>
      %67 = vector.broadcast %66 : vector<1x128xf32> to vector<8x128xf32>
      %68 = arith.subf %59, %67 : vector<8x128xf32>
      %69 = arith.mulf %68, %68 : vector<8x128xf32>
      %cst_33 = arith.constant dense<0.000000e+00> : vector<128xf32>
      %70 = vector.multi_reduction <add>, %69, %cst_33 [0] : vector<8x128xf32> to vector<128xf32>
      %71 = vector.shape_cast %70 : vector<128xf32> to vector<1x128xf32>
      %cst_34 = arith.constant 8.000000e+00 : f32
      %72 = vector.broadcast %cst_34 : f32 to vector<1x128xf32>
      %73 = arith.divf %71, %72 : vector<1x128xf32>
      %cst_35 = arith.constant 9.99999974E-6 : f32
      %74 = vector.broadcast %cst_35 : f32 to vector<1x128xf32>
      %75 = arith.addf %73, %74 : vector<1x128xf32>
      %76 = math.rsqrt %75 : vector<1x128xf32>
      %77 = arith.mulf %76, %61 : vector<1x128xf32>
      %78 = vector.broadcast %77 : vector<1x128xf32> to vector<8x128xf32>
      %79 = arith.mulf %68, %78 : vector<8x128xf32>
      %80 = vector.broadcast %62 : vector<1x128xf32> to vector<8x128xf32>
      %81 = arith.addf %79, %80 : vector<8x128xf32>
      %cst_36 = arith.constant 0.000000e+00 : f32
      %82 = vector.broadcast %cst_36 : f32 to vector<8x128xf32>
      %83 = arith.maximumf %81, %82 : vector<8x128xf32>
      %84 = arith.truncf %83 : vector<8x128xf32> to vector<8x128xbf16>
      %c0_37 = arith.constant 0 : index
      %c0_38 = arith.constant 0 : index
      %85 = vector.load %arg9[%c0_37, %c0_38] : memref<8x128xbf16, #tpu.memory_space<vmem>>, vector<8x128xbf16>
      tpu.vector_store %arg9[%c0_37, %c0_38], %84 {strides = array<i32>} : memref<8x128xbf16, #tpu.memory_space<vmem>>, vector<8x128xbf16>,
    } else {
    }
    %c0 = arith.constant 0 : index
    %c0_1 = arith.constant 0 : index
    %3 = vector.load %arg9[%c0, %c0_1] : memref<8x128xbf16, #tpu.memory_space<vmem>>, vector<8x128xbf16>
    %c0_2 = arith.constant 0 : index
    %c0_3 = arith.constant 0 : index
    %4 = vector.load %arg6[%c0_2, %c0_3] : memref<128x128xbf16, #tpu.memory_space<vmem>>, vector<128x128xbf16>
    %cst = arith.constant dense<0.000000e+00> : vector<8x128xf32>
    %5 = tpu.matmul %3, %4, %cst {dimension_numbers = #tpu.dot_dimension_numbers<[1], [0], [0], [1], [0, 0, 1, 1], [], []>} : vector<8x128xbf16>, vector<128x128xbf16>, vector<8x128xf32> -> vector<8x128xf32>
    %c0_4 = arith.constant 0 : index
    %c0_5 = arith.constant 0 : index
    %6 = vector.load %arg7[%c0_4, %c0_5] : memref<2x128xf32, #tpu.memory_space<vmem>>, vector<2x128xf32>
    %7 = vector.extract_strided_slice %6 {offsets = [0, 0], sizes = [1, 128], strides = [1, 1]} : vector<2x128xf32> to vector<1x128xf32>
    %8 = vector.extract_strided_slice %6 {offsets = [1, 0], sizes = [1, 128], strides = [1, 1]} : vector<2x128xf32> to vector<1x128xf32>
    %cst_6 = arith.constant dense<0.000000e+00> : vector<128xf32>
    %9 = vector.multi_reduction <add>, %5, %cst_6 [0] : vector<8x128xf32> to vector<128xf32>
    %10 = vector.shape_cast %9 : vector<128xf32> to vector<1x128xf32>
    %cst_7 = arith.constant 8.000000e+00 : f32
    %11 = vector.broadcast %cst_7 : f32 to vector<1x128xf32>
    %12 = arith.divf %10, %11 : vector<1x128xf32>
    %13 = vector.broadcast %12 : vector<1x128xf32> to vector<8x128xf32>
    %14 = arith.subf %5, %13 : vector<8x128xf32>
    %15 = arith.mulf %14, %14 : vector<8x128xf32>
    %cst_8 = arith.constant dense<0.000000e+00> : vector<128xf32>
    %16 = vector.multi_reduction <add>, %15, %cst_8 [0] : vector<8x128xf32> to vector<128xf32>
    %17 = vector.shape_cast %16 : vector<128xf32> to vector<1x128xf32>
    %cst_9 = arith.constant 8.000000e+00 : f32
    %18 = vector.broadcast %cst_9 : f32 to vector<1x128xf32>
    %19 = arith.divf %17, %18 : vector<1x128xf32>
    %cst_10 = arith.constant 9.99999974E-6 : f32
    %20 = vector.broadcast %cst_10 : f32 to vector<1x128xf32>
    %21 = arith.addf %19, %20 : vector<1x128xf32>
    %22 = math.rsqrt %21 : vector<1x128xf32>
    %23 = arith.mulf %22, %7 : vector<1x128xf32>
    %24 = vector.broadcast %23 : vector<1x128xf32> to vector<8x128xf32>
    %25 = arith.mulf %14, %24 : vector<8x128xf32>
    %26 = vector.broadcast %8 : vector<1x128xf32> to vector<8x128xf32>
    %27 = arith.addf %25, %26 : vector<8x128xf32>
    %c0_11 = arith.constant 0 : index
    %c0_12 = arith.constant 0 : index
    %28 = vector.load %arg8[%c0_11, %c0_12] : memref<8x128xf32, #tpu.memory_space<vmem>>, vector<8x128xf32>
    tpu.vector_store %arg8[%c0_11, %c0_12], %27 {strides = array<i32>} : memref<8x128xf32, #tpu.memory_space<vmem>>, vector<8x128xf32>,
    return
  }
  func.func @transform_0(%arg0: i32) -> (i32, i32) {
    %c0_i32 = arith.constant 0 : i32
    %c0_i32_0 = arith.constant 0 : i32
    %c0_i32_1 = arith.constant 0 : i32
    return %c0_i32, %c0_i32_0 : i32, i32
  }
  func.func @transform_1(%arg0: i32) -> (i32, i32) {
    %c0_i32 = arith.constant 0 : i32
    %c0_i32_0 = arith.constant 0 : i32
    %c0_i32_1 = arith.constant 0 : i32
    return %c0_i32, %c0_i32_0 : i32, i32
  }
  func.func @transform_2(%arg0: i32) -> (i32, i32) {
    %c0_i32 = arith.constant 0 : i32
    %c0_i32_0 = arith.constant 0 : i32
    %c0_i32_1 = arith.constant 0 : i32
    return %c0_i32, %c0_i32_0 : i32, i32
  }
  func.func @transform_3(%arg0: i32) -> (i32, i32) {
    %c0_i32 = arith.constant 0 : i32
    %c0_i32_0 = arith.constant 0 : i32
    %c0_i32_1 = arith.constant 0 : i32
    return %c0_i32, %c0_i32_0 : i32, i32
  }
  func.func @transform_4(%arg0: i32) -> (i32, i32) {
    %c0_i32 = arith.constant 0 : i32
    %c0_i32_0 = arith.constant 0 : i32
    %c0_i32_1 = arith.constant 0 : i32
    return %c0_i32, %c0_i32_0 : i32, i32
  }
  func.func @transform_5(%arg0: i32) -> (i32, i32) {
    %c0_i32 = arith.constant 0 : i32
    %c0_i32_0 = arith.constant 0 : i32
    return %c0_i32, %arg0 : i32, i32
  }
  func.func @transform_6(%arg0: i32) -> (i32, i32) {
    %c0_i32 = arith.constant 0 : i32
    %c0_i32_0 = arith.constant 0 : i32
    return %c0_i32, %arg0 : i32, i32
  }
  func.func @transform_7(%arg0: i32) -> (i32, i32) {
    %c0_i32 = arith.constant 0 : i32
    %c0_i32_0 = arith.constant 0 : i32
    return %c0_i32, %arg0 : i32, i32
  }
}

module attributes {stable_mosaic.version = 11 : i64} {
  func.func @_fused_mlp_kernel(%arg0: i32, %arg1: memref<8x64xf32, #tpu.memory_space<vmem>>, %arg2: memref<64x128xbf16, #tpu.memory_space<vmem>>, %arg3: memref<2x128xf32, #tpu.memory_space<vmem>>, %arg4: memref<128x128xbf16, #tpu.memory_space<vmem>>, %arg5: memref<2x128xf32, #tpu.memory_space<vmem>>, %arg6: memref<128x128xbf16, #tpu.memory_space<vmem>>, %arg7: memref<2x128xf32, #tpu.memory_space<vmem>>, %arg8: memref<8x128xf32, #tpu.memory_space<vmem>>, %arg9: memref<8x128xbf16, #tpu.memory_space<vmem>>) attributes {dimension_semantics = [#tpu.dimension_semantics<arbitrary>], iteration_bounds = array<i64: 1>, scalar_prefetch = 0 : i64, scratch_operands = 1 : i64, tpu.core_type = #tpu.core_type<tc>, window_params = [{pipeline_mode = #tpu.pipeline_mode<synchronous>, transform_indices = @transform_0, window_bounds = array<i64: 8, 64>}, {pipeline_mode = #tpu.pipeline_mode<synchronous>, transform_indices = @transform_1, window_bounds = array<i64: 64, 128>}, {pipeline_mode = #tpu.pipeline_mode<synchronous>, transform_indices = @transform_2, window_bounds = array<i64: 2, 128>}, {pipeline_mode = #tpu.pipeline_mode<synchronous>, transform_indices = @transform_3, window_bounds = array<i64: 128, 128>}, {pipeline_mode = #tpu.pipeline_mode<synchronous>, transform_indices = @transform_4, window_bounds = array<i64: 2, 128>}, {transform_indices = @transform_5, window_bounds = array<i64: 128, 128>}, {transform_indices = @transform_6, window_bounds = array<i64: 2, 128>}, {transform_indices = @transform_7, window_bounds = array<i64: 8, 128>}]} {
    %c0_i32 = arith.constant 0 : i32
    %0 = arith.cmpi eq, %arg0, %c0_i32 : i32
    %1 = arith.extui %0 : i1 to i32
    %c0_i32_0 = arith.constant 0 : i32
    %2 = arith.cmpi ne, %1, %c0_i32_0 : i32
    scf.if %2 {
      %c0_13 = arith.constant 0 : index
      %c0_14 = arith.constant 0 : index
      %29 = vector.load %arg1[%c0_13, %c0_14] : memref<8x64xf32, #tpu.memory_space<vmem>>, vector<8x64xf32>
      %c0_15 = arith.constant 0 : index
      %c0_16 = arith.constant 0 : index
      %30 = vector.load %arg2[%c0_15, %c0_16] : memref<64x128xbf16, #tpu.memory_space<vmem>>, vector<64x128xbf16>
      %31 = arith.truncf %29 : vector<8x64xf32> to vector<8x64xbf16>
      %cst_17 = arith.constant dense<0.000000e+00> : vector<8x128xf32>
      %32 = tpu.matmul %31, %30, %cst_17 {dimension_numbers = #tpu.dot_dimension_numbers<[1], [0], [0], [1], [0, 0, 1, 1], [], []>} : vector<8x64xbf16>, vector<64x128xbf16>, vector<8x128xf32> -> vector<8x128xf32>
      %c0_18 = arith.constant 0 : index
      %c0_19 = arith.constant 0 : index
      %33 = vector.load %arg3[%c0_18, %c0_19] : memref<2x128xf32, #tpu.memory_space<vmem>>, vector<2x128xf32>
      %34 = vector.extract_strided_slice %33 {offsets = [0, 0], sizes = [1, 128], strides = [1, 1]} : vector<2x128xf32> to vector<1x128xf32>
      %35 = vector.extract_strided_slice %33 {offsets = [1, 0], sizes = [1, 128], strides = [1, 1]} : vector<2x128xf32> to vector<1x128xf32>
      %cst_20 = arith.constant dense<0.000000e+00> : vector<128xf32>
      %36 = vector.multi_reduction <add>, %32, %cst_20 [0] : vector<8x128xf32> to vector<128xf32>
      %37 = vector.shape_cast %36 : vector<128xf32> to vector<1x128xf32>
      %cst_21 = arith.constant 8.000000e+00 : f32
      %38 = vector.broadcast %cst_21 : f32 to vector<1x128xf32>
      %39 = arith.divf %37, %38 : vector<1x128xf32>
      %40 = vector.broadcast %39 : vector<1x128xf32> to vector<8x128xf32>
      %41 = arith.subf %32, %40 : vector<8x128xf32>
      %42 = arith.mulf %41, %41 : vector<8x128xf32>
      %cst_22 = arith.constant dense<0.000000e+00> : vector<128xf32>
      %43 = vector.multi_reduction <add>, %42, %cst_22 [0] : vector<8x128xf32> to vector<128xf32>
      %44 = vector.shape_cast %43 : vector<128xf32> to vector<1x128xf32>
      %cst_23 = arith.constant 8.000000e+00 : f32
      %45 = vector.broadcast %cst_23 : f32 to vector<1x128xf32>
      %46 = arith.divf %44, %45 : vector<1x128xf32>
      %cst_24 = arith.constant 9.99999974E-6 : f32
      %47 = vector.broadcast %cst_24 : f32 to vector<1x128xf32>
      %48 = arith.addf %46, %47 : vector<1x128xf32>
      %49 = math.rsqrt %48 : vector<1x128xf32>
      %50 = arith.mulf %49, %34 : vector<1x128xf32>
      %51 = vector.broadcast %50 : vector<1x128xf32> to vector<8x128xf32>
      %52 = arith.mulf %41, %51 : vector<8x128xf32>
      %53 = vector.broadcast %35 : vector<1x128xf32> to vector<8x128xf32>
      %54 = arith.addf %52, %53 : vector<8x128xf32>
      %cst_25 = arith.constant 0.000000e+00 : f32
      %55 = vector.broadcast %cst_25 : f32 to vector<8x128xf32>
      %56 = arith.maximumf %54, %55 : vector<8x128xf32>
      %c0_26 = arith.constant 0 : index
      %c0_27 = arith.constant 0 : index
      %57 = vector.load %arg4[%c0_26, %c0_27] : memref<128x128xbf16, #tpu.memory_space<vmem>>, vector<128x128xbf16>
      %58 = arith.truncf %56 : vector<8x128xf32> to vector<8x128xbf16>
      %cst_28 = arith.constant dense<0.000000e+00> : vector<8x128xf32>
      %59 = tpu.matmul %58, %57, %cst_28 {dimension_numbers = #tpu.dot_dimension_numbers<[1], [0], [0], [1], [0, 0, 1, 1], [], []>} : vector<8x128xbf16>, vector<128x128xbf16>, vector<8x128xf32> -> vector<8x128xf32>
      %c0_29 = arith.constant 0 : index
      %c0_30 = arith.constant 0 : index
      %60 = vector.load %arg5[%c0_29, %c0_30] : memref<2x128xf32, #tpu.memory_space<vmem>>, vector<2x128xf32>
      %61 = vector.extract_strided_slice %60 {offsets = [0, 0], sizes = [1, 128], strides = [1, 1]} : vector<2x128xf32> to vector<1x128xf32>
      %62 = vector.extract_strided_slice %60 {offsets = [1, 0], sizes = [1, 128], strides = [1, 1]} : vector<2x128xf32> to vector<1x128xf32>
      %cst_31 = arith.constant dense<0.000000e+00> : vector<128xf32>
      %63 = vector.multi_reduction <add>, %59, %cst_31 [0] : vector<8x128xf32> to vector<128xf32>
      %64 = vector.shape_cast %63 : vector<128xf32> to vector<1x128xf32>
      %cst_32 = arith.constant 8.000000e+00 : f32
      %65 = vector.broadcast %cst_32 : f32 to vector<1x128xf32>
      %66 = arith.divf %64, %65 : vector<1x128xf32>
      %67 = vector.broadcast %66 : vector<1x128xf32> to vector<8x128xf32>
      %68 = arith.subf %59, %67 : vector<8x128xf32>
      %69 = arith.mulf %68, %68 : vector<8x128xf32>
      %cst_33 = arith.constant dense<0.000000e+00> : vector<128xf32>
      %70 = vector.multi_reduction <add>, %69, %cst_33 [0] : vector<8x128xf32> to vector<128xf32>
      %71 = vector.shape_cast %70 : vector<128xf32> to vector<1x128xf32>
      %cst_34 = arith.constant 8.000000e+00 : f32
      %72 = vector.broadcast %cst_34 : f32 to vector<1x128xf32>
      %73 = arith.divf %71, %72 : vector<1x128xf32>
      %cst_35 = arith.constant 9.99999974E-6 : f32
      %74 = vector.broadcast %cst_35 : f32 to vector<1x128xf32>
      %75 = arith.addf %73, %74 : vector<1x128xf32>
      %76 = math.rsqrt %75 : vector<1x128xf32>
      %77 = arith.mulf %76, %61 : vector<1x128xf32>
      %78 = vector.broadcast %77 : vector<1x128xf32> to vector<8x128xf32>
      %79 = arith.mulf %68, %78 : vector<8x128xf32>
      %80 = vector.broadcast %62 : vector<1x128xf32> to vector<8x128xf32>
      %81 = arith.addf %79, %80 : vector<8x128xf32>
      %cst_36 = arith.constant 0.000000e+00 : f32
      %82 = vector.broadcast %cst_36 : f32 to vector<8x128xf32>
      %83 = arith.maximumf %81, %82 : vector<8x128xf32>
      %84 = arith.truncf %83 : vector<8x128xf32> to vector<8x128xbf16>
      %c0_37 = arith.constant 0 : index
      %c0_38 = arith.constant 0 : index
      %85 = vector.load %arg9[%c0_37, %c0_38] : memref<8x128xbf16, #tpu.memory_space<vmem>>, vector<8x128xbf16>
      tpu.vector_store %arg9[%c0_37, %c0_38], %84 {strides = array<i32>} : memref<8x128xbf16, #tpu.memory_space<vmem>>, vector<8x128xbf16>,
    } else {
    }
    %c0 = arith.constant 0 : index
    %c0_1 = arith.constant 0 : index
    %3 = vector.load %arg9[%c0, %c0_1] : memref<8x128xbf16, #tpu.memory_space<vmem>>, vector<8x128xbf16>
    %c0_2 = arith.constant 0 : index
    %c0_3 = arith.constant 0 : index
    %4 = vector.load %arg6[%c0_2, %c0_3] : memref<128x128xbf16, #tpu.memory_space<vmem>>, vector<128x128xbf16>
    %cst = arith.constant dense<0.000000e+00> : vector<8x128xf32>
    %5 = tpu.matmul %3, %4, %cst {dimension_numbers = #tpu.dot_dimension_numbers<[1], [0], [0], [1], [0, 0, 1, 1], [], []>} : vector<8x128xbf16>, vector<128x128xbf16>, vector<8x128xf32> -> vector<8x128xf32>
    %c0_4 = arith.constant 0 : index
    %c0_5 = arith.constant 0 : index
    %6 = vector.load %arg7[%c0_4, %c0_5] : memref<2x128xf32, #tpu.memory_space<vmem>>, vector<2x128xf32>
    %7 = vector.extract_strided_slice %6 {offsets = [0, 0], sizes = [1, 128], strides = [1, 1]} : vector<2x128xf32> to vector<1x128xf32>
    %8 = vector.extract_strided_slice %6 {offsets = [1, 0], sizes = [1, 128], strides = [1, 1]} : vector<2x128xf32> to vector<1x128xf32>
    %cst_6 = arith.constant dense<0.000000e+00> : vector<128xf32>
    %9 = vector.multi_reduction <add>, %5, %cst_6 [0] : vector<8x128xf32> to vector<128xf32>
    %10 = vector.shape_cast %9 : vector<128xf32> to vector<1x128xf32>
    %cst_7 = arith.constant 8.000000e+00 : f32
    %11 = vector.broadcast %cst_7 : f32 to vector<1x128xf32>
    %12 = arith.divf %10, %11 : vector<1x128xf32>
    %13 = vector.broadcast %12 : vector<1x128xf32> to vector<8x128xf32>
    %14 = arith.subf %5, %13 : vector<8x128xf32>
    %15 = arith.mulf %14, %14 : vector<8x128xf32>
    %cst_8 = arith.constant dense<0.000000e+00> : vector<128xf32>
    %16 = vector.multi_reduction <add>, %15, %cst_8 [0] : vector<8x128xf32> to vector<128xf32>
    %17 = vector.shape_cast %16 : vector<128xf32> to vector<1x128xf32>
    %cst_9 = arith.constant 8.000000e+00 : f32
    %18 = vector.broadcast %cst_9 : f32 to vector<1x128xf32>
    %19 = arith.divf %17, %18 : vector<1x128xf32>
    %cst_10 = arith.constant 9.99999974E-6 : f32
    %20 = vector.broadcast %cst_10 : f32 to vector<1x128xf32>
    %21 = arith.addf %19, %20 : vector<1x128xf32>
    %22 = math.rsqrt %21 : vector<1x128xf32>
    %23 = arith.mulf %22, %7 : vector<1x128xf32>
    %24 = vector.broadcast %23 : vector<1x128xf32> to vector<8x128xf32>
    %25 = arith.mulf %14, %24 : vector<8x128xf32>
    %26 = vector.broadcast %8 : vector<1x128xf32> to vector<8x128xf32>
    %27 = arith.addf %25, %26 : vector<8x128xf32>
    %c0_11 = arith.constant 0 : index
    %c0_12 = arith.constant 0 : index
    %28 = vector.load %arg8[%c0_11, %c0_12] : memref<8x128xf32, #tpu.memory_space<vmem>>, vector<8x128xf32>
    tpu.vector_store %arg8[%c0_11, %c0_12], %27 {strides = array<i32>} : memref<8x128xf32, #tpu.memory_space<vmem>>, vector<8x128xf32>,
    return
  }
  func.func @transform_0(%arg0: i32) -> (i32, i32) {
    %c0_i32 = arith.constant 0 : i32
    %c0_i32_0 = arith.constant 0 : i32
    %c0_i32_1 = arith.constant 0 : i32
    return %c0_i32, %c0_i32_0 : i32, i32
  }
  func.func @transform_1(%arg0: i32) -> (i32, i32) {
    %c0_i32 = arith.constant 0 : i32
    %c0_i32_0 = arith.constant 0 : i32
    %c0_i32_1 = arith.constant 0 : i32
    return %c0_i32, %c0_i32_0 : i32, i32
  }
  func.func @transform_2(%arg0: i32) -> (i32, i32) {
    %c0_i32 = arith.constant 0 : i32
    %c0_i32_0 = arith.constant 0 : i32
    %c0_i32_1 = arith.constant 0 : i32
    return %c0_i32, %c0_i32_0 : i32, i32
  }
  func.func @transform_3(%arg0: i32) -> (i32, i32) {
    %c0_i32 = arith.constant 0 : i32
    %c0_i32_0 = arith.constant 0 : i32
    %c0_i32_1 = arith.constant 0 : i32
    return %c0_i32, %c0_i32_0 : i32, i32
  }
  func.func @transform_4(%arg0: i32) -> (i32, i32) {
    %c0_i32 = arith.constant 0 : i32
    %c0_i32_0 = arith.constant 0 : i32
    %c0_i32_1 = arith.constant 0 : i32
    return %c0_i32, %c0_i32_0 : i32, i32
  }
  func.func @transform_5(%arg0: i32) -> (i32, i32) {
    %c0_i32 = arith.constant 0 : i32
    %c0_i32_0 = arith.constant 0 : i32
    return %c0_i32, %arg0 : i32, i32
  }
  func.func @transform_6(%arg0: i32) -> (i32, i32) {
    %c0_i32 = arith.constant 0 : i32
    %c0_i32_0 = arith.constant 0 : i32
    return %c0_i32, %arg0 : i32, i32
  }
  func.func @transform_7(%arg0: i32) -> (i32, i32) {
    %c0_i32 = arith.constant 0 : i32
    %c0_i32_0 = arith.constant 0 : i32
    return %c0_i32, %arg0 : i32, i32
  }
}

</mosaic_0001>

<bundles_post_ra>
// kernel: tpu_custom_call.1
= control target key start
LH: loop header
LB: loop body
LE: loop exit
PB: predicated region body
PF: predicated region fallthrough
CT: control target
= control target key end

     0   :  { %12 = vsyncpa [#allocation4], 0  ;;  %s899_s0 = inlined_call_operand.hbm [shape: f32[8,64], index: 0, kind: input, shape index: {}]   ;;  %s900_s1 = inlined_call_operand.hbm [shape: bf16[64,128], index: 1, kind: input, shape index: {}]   ;;  %s901_s2 = inlined_call_operand.vmem [shape: f32[2,128], index: 2, kind: input, shape index: {}]   ;;  %s902_s3 = inlined_call_operand.hbm [shape: bf16[128,128], index: 3, kind: input, shape index: {}]   ;;  %s903_s4 = inlined_call_operand.vmem [shape: f32[2,128], index: 4, kind: input, shape index: {}]   ;;  %s904_s5 = inlined_call_operand.hbm [shape: bf16[128,128], index: 5, kind: input, shape index: {}]   ;;  %s905_s6 = inlined_call_operand.vmem [shape: f32[2,128], index: 6, kind: input, shape index: {}]   ;;  %s906_s7 = inlined_call_operand.hbm [shape: f32[8,128], index: 7, kind: output, shape index: {}]  }
   0x1   :  { %13 = vsyncpa [#allocation7], 0 }
   0x2   :  { %14 = vsyncpa [#allocation10], 0 }
   0x3   :  { %15 = vsyncpa [#allocation5], 0  ;;  %s736_s24 = smov [#allocation6]   ;;  %s618_s28 = scalar_lea.hbm %s900_s1, 512 }
   0x4   :  { %s31_s25 = sshll.u32 %s736_s24, 4  ;;  %p619_p0 = scmp.ne.s32.totalorder %s900_s1, %s618_s28  ;;  %s32_s25 = int_to_ptr.vmem [resolvable:$true] %s31_s25 }
   0x5   :  { %p622_p1 = scmp.lt.u32.totalorder %s618_s28, %s900_s1 }
   0x7   :  { %p624_p2 = pnand %p622_p1, %p619_p0 }
   0x9   :  { %627 = shalt.err (!%p624_p2)
}
   0xa   :  { %s628_s10 = scalar_lea.vmem %s32_s25, 512  ;;  %p633_p4 = scmp.lt.s32.totalorder %s32_s25, %s32_s25 }
   0xb   :  { %p629_p3 = scmp.ne.s32.totalorder %s32_s25, %s628_s10  ;;  %p634_p5 = scmp.lt.s32.totalorder %s628_s10, %s628_s10 }
   0xd   :  { %p635_p6 = por %p634_p5, %p633_p4 }
   0xf   :  { %p636_p7 = pnand %p635_p6, %p629_p3 }
  0x11   :  { %639 = shalt.err (!%p636_p7)
}
  0x12   :  { %s737_s11 = smov 64   ;;  %s738_s12 = smov 4  }
  0x13   :  { %37 = dma.hbm_to_vmem [thread:$0]  %s900_s1, 512, %s32_s25, [#allocation7], %s737_s11, %s737_s11, %s738_s12  }
  0x14   :  { %s739_s15 = smov [#allocation3]   ;;  %s740_s17 = smov [#allocation8]  }
  0x15   :  { %s22_s16 = sshll.u32 %s739_s15, 4  ;;  %s45_s18 = sshll.u32 %s740_s17, 4  ;;  %s23_s16 = int_to_ptr.vmem [resolvable:$true] %s22_s16  ;;  %s46_s18 = int_to_ptr.vmem [resolvable:$true] %s45_s18 }
  0x16   :  { %s640_s21 = scalar_lea.hbm %s899_s0, 128 }
  0x17   :  { %p641_p8 = scmp.ne.s32.totalorder %s899_s0, %s640_s21  ;;  %p644_p9 = scmp.lt.u32.totalorder %s640_s21, %s899_s0 }
  0x19   :  { %p646_p10 = pnand %p644_p9, %p641_p8 }
  0x1b   :  { %649 = shalt.err (!%p646_p10)
}
  0x1c   :  { %s650_s1 = scalar_lea.vmem %s23_s16, 128  ;;  %p655_p12 = scmp.lt.s32.totalorder %s23_s16, %s23_s16 }
  0x1d   :  { %p651_p11 = scmp.ne.s32.totalorder %s23_s16, %s650_s1  ;;  %p656_p13 = scmp.lt.s32.totalorder %s650_s1, %s650_s1 }
  0x1f   :  { %p657_p0 = por %p656_p13, %p655_p12 }
  0x21   :  { %p658_p1 = pnand %p657_p0, %p651_p11 }
  0x23   :  { %661 = shalt.err (!%p658_p1)
}
  0x24   :  { %25 = dma.hbm_to_vmem [thread:$0]  %s899_s0, 128, %s23_s16, [#allocation4]  }
  0x25   :  { %s662_s30 = scalar_lea.hbm %s902_s3, 1024 }
  0x26   :  { %p663_p2 = scmp.ne.s32.totalorder %s902_s3, %s662_s30  ;;  %p666_p3 = scmp.lt.u32.totalorder %s662_s30, %s902_s3 }
  0x28   :  { %p668_p4 = pnand %p666_p3, %p663_p2 }
  0x2a   :  { %671 = shalt.err (!%p668_p4)
}
  0x2b   :  { %s672_s14 = scalar_lea.vmem %s46_s18, 1024  ;;  %p677_p6 = scmp.lt.s32.totalorder %s46_s18, %s46_s18 }
  0x2c   :  { %p673_p5 = scmp.ne.s32.totalorder %s46_s18, %s672_s14  ;;  %p678_p7 = scmp.lt.s32.totalorder %s672_s14, %s672_s14 }
  0x2e   :  { %p679_p8 = por %p678_p7, %p677_p6 }
  0x30   :  { %p680_p9 = pnand %p679_p8, %p673_p5 }
  0x32   :  { %683 = shalt.err (!%p680_p9)
}
  0x33   :  { %51 = dma.hbm_to_vmem [thread:$0]  %s902_s3, 1024, %s46_s18, [#allocation7], %s737_s11, %s737_s11, %s738_s12  }
  0x34   :  { %s741_s16 = smov [#allocation9]   ;;  %s684_s21 = scalar_lea.hbm %s904_s5, 1024 }
  0x35   :  { %s59_s17 = sshll.u32 %s741_s16, 4  ;;  %p685_p10 = scmp.ne.s32.totalorder %s904_s5, %s684_s21  ;;  %s60_s17 = int_to_ptr.vmem [resolvable:$true] %s59_s17 }
  0x36   :  { %p688_p11 = scmp.lt.u32.totalorder %s684_s21, %s904_s5 }
  0x38   :  { %p690_p12 = pnand %p688_p11, %p685_p10 }
  0x3a   :  { %693 = shalt.err (!%p690_p12)
}
  0x3b   :  { %s694_s1 = scalar_lea.vmem %s60_s17, 1024  ;;  %p699_p0 = scmp.lt.s32.totalorder %s60_s17, %s60_s17 }
  0x3c   :  { %p695_p13 = scmp.ne.s32.totalorder %s60_s17, %s694_s1  ;;  %p700_p1 = scmp.lt.s32.totalorder %s694_s1, %s694_s1 }
  0x3e   :  { %p701_p2 = por %p700_p1, %p699_p0 }
  0x40   :  { %p702_p3 = pnand %p701_p2, %p695_p13 }
  0x42   :  { %705 = shalt.err (!%p702_p3)
}
  0x43   :  { %65 = dma.hbm_to_vmem [thread:$0]  %s904_s5, 1024, %s60_s17, [#allocation10], %s737_s11, %s737_s11, %s738_s12  }
  0x44   :  { %728 = dma.done.wait [#allocation4], 128  }
  0x45   :  { %729 = vsyncadd [#allocation4], 4294967168 }
  0x46   :  { %730 = dma.done.wait [#allocation7], 1536  }
  0x47   :  { %731 = vsyncadd [#allocation7], 4294965760 }
  0x48   :  { %732 = dma.done.wait [#allocation10], 1024  }
  0x49   :  { %733 = vsyncadd [#allocation10], 4294966272  ;;  %v742_v0 = vmov 0.0   ;;  %vm743_vm0 = vmmov 0   ;;  %v592_v1 = vld [vmem:[#allocation6] sm:$0xff]   ;;  %v593_v2 = vld [vmem:[#allocation6 + $0x8] sm:$0xff]   ;;  %v184_v36 = vlaneseq }
  0x4a   :  { %531 = vmatprep.subr.bf16.mxu0 %v742_v0  ;;  %539 = vmatprep.mubr.msk.bf16.mxu0 %vm743_vm0, %v742_v0  ;;  %v594_v3 = vld [vmem:[#allocation6 + $0x10] sm:$0xff]   ;;  %vm119_vm1 = vcmask 523264   ;;  %v595_v4 = vld [vmem:[#allocation6 + $0x18] sm:$0xff]   ;;  %v596_v7 = vld [vmem:[#allocation8] sm:$0xff]   ;;  %s744_s27 = smov [#allocation11]  }
  0x4b   :  { %543 = vmatprep.subr.bf16.mxu1 %v742_v0  ;;  %559 = vmatprep.mubr.msk.bf16.mxu1 %vm743_vm0, %v742_v0  ;;  %v85_v5 = vld [vmem:[#allocation3] sm:$0xff]  ;;  %v597_v8 = vld [vmem:[#allocation8 + $0x8] sm:$0xff]   ;;  %v598_v9 = vld [vmem:[#allocation8 + $0x10] sm:$0xff]   ;;  %v185_v37 = vshrl.u32 %v184_v36, 7  ;;  %s476_s28 = sshll.u32 %s744_s27, 4  ;;  %s477_s28 = int_to_ptr.vmem [resolvable:$true] %s476_s28 }
  0x4c   :  { %532 = vmatpush3.bf16.msra.mxu0 %v592_v1  ;;  %v94_v6 = vpack.c.bf16 %v85_v5, %v85_v5  ;;  %544 = vmatpush3.bf16.msra.mxu1 %v596_v7  ;;  %v599_v10 = vld [vmem:[#allocation8 + $0x18] sm:$0xff]   ;;  %v600_v11 = vld [vmem:[#allocation8 + $0x20] sm:$0xff]   ;;  %v601_v12 = vld [vmem:[#allocation8 + $0x28] sm:$0xff]   ;;  %s706_s29 = scalar_lea.vmem %s477_s28, 128  ;;  %p711_p5 = scmp.lt.s32.totalorder %s477_s28, %s477_s28 }
  0x4d   :  { %533 = vmatprep.subr.bf16.mxu0 %v742_v0  ;;  %545 = vmatprep.subr.bf16.mxu1 %v742_v0  ;;  %v602_v13 = vld [vmem:[#allocation8 + $0x30] sm:$0xff]   ;;  %v603_v14 = vld [vmem:[#allocation8 + $0x38] sm:$0xff]   ;;  %v864_v39 = vsub.s32 0, %v185_v37  ;;  %v866_v40 = vsub.s32 1, %v185_v37  ;;  %v604_v49 = vld [vmem:[#allocation9] sm:$0xff]   ;;  %p707_p4 = scmp.ne.s32.totalorder %s477_s28, %s706_s29  ;;  %p712_p6 = scmp.lt.s32.totalorder %s706_s29, %s706_s29 }
  0x4e   :  { %v163_v38 = vld [vmem:[%s901_s2] sm:$0x3]  ;;  %v605_v50 = vld [vmem:[#allocation9 + $0x8] sm:$0xff]   ;;  %v607_v52 = vld [vmem:[#allocation9 + $0x18] sm:$0xff]  }
  0x4f   :  { %v192_v44 = vrot.slane %v163_v38, %v866_v40  ;;  %v606_v51 = vld [vmem:[#allocation9 + $0x10] sm:$0xff]   ;;  %v608_v53 = vld [vmem:[#allocation9 + $0x20] sm:$0xff]   ;;  %v609_v54 = vld [vmem:[#allocation9 + $0x28] sm:$0xff]   ;;  %p713_p7 = por %p712_p6, %p711_p5 }
  0x50   :  { %534 = vmatpush3.bf16.msra.mxu0 %v593_v2  ;;  %546 = vmatpush3.bf16.msra.mxu1 %v597_v8  ;;  %v610_v55 = vld [vmem:[#allocation9 + $0x30] sm:$0xff]   ;;  %v611_v56 = vld [vmem:[#allocation9 + $0x38] sm:$0xff]  }
  0x51   :  { %535 = vmatprep.subr.bf16.mxu0 %v742_v0  ;;  %547 = vmatprep.subr.bf16.mxu1 %v742_v0  ;;  %p714_p8 = pnand %p713_p7, %p707_p4 }
  0x54   :  { %536 = vmatpush3.bf16.msra.mxu0 %v594_v3  ;;  %548 = vmatpush3.bf16.msra.mxu1 %v598_v9 }
  0x55   :  { %537 = vmatprep.subr.bf16.mxu0 %v742_v0  ;;  %549 = vmatprep.subr.bf16.mxu1 %v742_v0 }
  0x58   :  { %538 = vmatpush3.bf16.msra.mxu0 %v595_v4  ;;  %550 = vmatpush3.bf16.msra.mxu1 %v599_v10 }
  0x59   :  { %563 = vmatprep.subr.bf16.mxu0 %v742_v0  ;;  %551 = vmatprep.subr.bf16.mxu1 %v742_v0 }
  0x5b   :  { %540 = vmatmul.mubr.msk.bf16.vlgmr.msra.gmra.mrb[0].mxu0 %vm119_vm1, %v94_v6 }
  0x5c   :  { %579 = vmatprep.mubr.msk.bf16.mxu0 %vm743_vm0, %v742_v0  ;;  %552 = vmatpush3.bf16.msra.mxu1 %v600_v11 }
  0x5d   :  { %553 = vmatprep.subr.bf16.mxu1 %v742_v0  ;;  %564 = vmatpush3.bf16.msra.mxu0 %v604_v49 }
  0x5e   :  { %565 = vmatprep.subr.bf16.mxu0 %v742_v0 }
  0x60   :  { %554 = vmatpush3.bf16.msra.mxu1 %v601_v12 }
  0x61   :  { %555 = vmatprep.subr.bf16.mxu1 %v742_v0  ;;  %566 = vmatpush3.bf16.msra.mxu0 %v605_v50 }
  0x62   :  { %567 = vmatprep.subr.bf16.mxu0 %v742_v0 }
  0x64   :  { %556 = vmatpush3.bf16.msra.mxu1 %v602_v13 }
  0x65   :  { %557 = vmatprep.subr.bf16.mxu1 %v742_v0  ;;  %568 = vmatpush3.bf16.msra.mxu0 %v606_v51 }
  0x66   :  { %569 = vmatprep.subr.bf16.mxu0 %v742_v0 }
  0x68   :  { %558 = vmatpush3.bf16.msra.mxu1 %v603_v14  ;;  %v300_v14 = vld [vmem:[%s903_s4] sm:$0x3] }
  0x69   :  { %570 = vmatpush3.bf16.msra.mxu0 %v607_v52 }
  0x6a   :  { %571 = vmatprep.subr.bf16.mxu0 %v742_v0 }
  0x6d   :  { %572 = vmatpush3.bf16.msra.mxu0 %v608_v53 }
  0x6e   :  { %573 = vmatprep.subr.bf16.mxu0 %v742_v0 }
  0x71   :  { %574 = vmatpush3.bf16.msra.mxu0 %v609_v54 }
  0x72   :  { %575 = vmatprep.subr.bf16.mxu0 %v742_v0 }
  0x75   :  { %576 = vmatpush3.bf16.msra.mxu0 %v610_v55 }
  0x76   :  { %577 = vmatprep.subr.bf16.mxu0 %v742_v0 }
  0x79   :  { %578 = vmatpush3.bf16.msra.mxu0 %v611_v56 }
 0x12e   :  { %v157_v15 = vpop.f32.mrb[0].mxu0 }
 0x12f   :  { %v164_v16 = vrot.slane %v157_v15, 4  ;;  %v541_v17 = vpop.f32.mrb[1].mxu0 }
 0x130   :  { %v160_v18 = vpop.f32.mrb[2].mxu0 }
 0x131   :  { %v165_v19 = vadd.f32 %v164_v16, %v157_v15  ;;  %v542_v20 = vpop.f32.mrb[3].mxu0  ;;  %v328_v18 = vrot.slane %v300_v14, %v866_v40 }
 0x133   :  { %v166_v21 = vrot.slane %v165_v19, 2 }
 0x135   :  { %v167_v22 = vadd.f32 %v166_v21, %v165_v19 }
 0x137   :  { %v168_v23 = vrot.slane %v167_v22, 1 }
 0x139   :  { %v169_v24 = vadd.f32 %v168_v23, %v167_v22 }
 0x13b   :  { %v171_v25 = vmul.f32 0.125, %v169_v24 }
 0x13d   :  { %v172_v26 = vsub.f32 %v157_v15, %v171_v25 }
 0x13f   :  { %v173_v27 = vmul.f32 %v172_v26, %v172_v26 }
 0x141   :  { %v174_v28 = vrot.slane %v173_v27, 4 }
 0x143   :  { %v175_v29 = vadd.f32 %v174_v28, %v173_v27 }
 0x145   :  { %v176_v30 = vrot.slane %v175_v29, 2 }
 0x147   :  { %v177_v31 = vadd.f32 %v176_v30, %v175_v29 }
 0x149   :  { %v178_v32 = vrot.slane %v177_v31, 1 }
 0x14b   :  { %v179_v33 = vadd.f32 %v178_v32, %v177_v31 }
 0x14d   :  { %v180_v34 = vmul.f32 0.125, %v179_v33 }
 0x14f   :  { %v181_v35 = vadd.f32 1e-05, %v180_v34 }
 0x151   :  { %612 = vrsqrt.f32 %v181_v35 }
 0x15b   :  { %v613_v41 = vpop.eup %612 }
 0x15c   :  { %v183_v42 = vmul.f32 %v613_v41, %v163_v38 }
 0x15e   :  { %v187_v43 = vrot.slane %v183_v42, %v864_v39 }
 0x160   :  { %v188_v45 = vmul.f32 %v187_v43, %v172_v26 }
 0x162   :  { %v193_v46 = vadd.f32 %v192_v44, %v188_v45 }
 0x164   :  { %v194_v47 = vmax.f32 %v193_v46, 0.0 }
 0x166   :  { %v211_v48 = vpack.c.bf16 %v194_v47, %v194_v47  ;;  %v438_v47 = vld [vmem:[%s905_s6] sm:$0x3] }
 0x167   :  { %v467_v51 = vrot.slane %v438_v47, %v866_v40 }
 0x168   :  { %560 = vmatmul.mubr.bf16.vlgmr.msra.gmra.mrb[0].mxu1 %v211_v48 }
 0x23b   :  { %v294_v57 = vpop.f32.mrb[0].mxu1 }
 0x23c   :  { %v301_v58 = vrot.slane %v294_v57, 4  ;;  %v561_v59 = vpop.f32.mrb[1].mxu1 }
 0x23d   :  { %v297_v60 = vpop.f32.mrb[2].mxu1 }
 0x23e   :  { %v302_v61 = vadd.f32 %v301_v58, %v294_v57  ;;  %v562_v62 = vpop.f32.mrb[3].mxu1 }
 0x240   :  { %v303_v63 = vrot.slane %v302_v61, 2 }
 0x242   :  { %v304_v1 = vadd.f32 %v303_v63, %v302_v61 }
 0x244   :  { %v305_v2 = vrot.slane %v304_v1, 1 }
 0x246   :  { %v306_v3 = vadd.f32 %v305_v2, %v304_v1 }
 0x248   :  { %v307_v4 = vmul.f32 0.125, %v306_v3 }
 0x24a   :  { %v308_v5 = vsub.f32 %v294_v57, %v307_v4 }
 0x24c   :  { %v309_v6 = vmul.f32 %v308_v5, %v308_v5 }
 0x24e   :  { %v310_v7 = vrot.slane %v309_v6, 4 }
 0x250   :  { %v311_v8 = vadd.f32 %v310_v7, %v309_v6 }
 0x252   :  { %v312_v9 = vrot.slane %v311_v8, 2 }
 0x254   :  { %v313_v10 = vadd.f32 %v312_v9, %v311_v8 }
 0x256   :  { %v314_v11 = vrot.slane %v313_v10, 1 }
 0x258   :  { %v315_v0 = vadd.f32 %v314_v11, %v313_v10 }
 0x25a   :  { %v316_v12 = vmul.f32 0.125, %v315_v0 }
 0x25c   :  { %v317_v13 = vadd.f32 1e-05, %v316_v12 }
 0x25e   :  { %614 = vrsqrt.f32 %v317_v13 }
 0x268   :  { %v615_v15 = vpop.eup %614 }
 0x269   :  { %v319_v16 = vmul.f32 %v615_v15, %v300_v14 }
 0x26b   :  { %v323_v17 = vrot.slane %v319_v16, %v864_v39 }
 0x26d   :  { %v324_v19 = vmul.f32 %v323_v17, %v308_v5 }
 0x26f   :  { %v329_v20 = vadd.f32 %v328_v18, %v324_v19 }
 0x271   :  { %v330_v21 = vmax.f32 %v329_v20, 0.0 }
 0x273   :  { %v331_v22 = vpack.c.bf16 %v330_v21, %v330_v21 }
 0x275   :  { %332 = vst [vmem:[#allocation2] sm:$0xf] %v331_v22 }
 0x27c   :  { %v333_v23 = vld [vmem:[#allocation2] sm:$0xf] }
 0x27d   :  { %580 = vmatmul.mubr.bf16.vlgmr.msra.gmra.mrb[4].mxu0 %v333_v23 }
 0x350   :  { %v432_v24 = vpop.f32.mrb[4].mxu0 }
 0x351   :  { %v439_v25 = vrot.slane %v432_v24, 4  ;;  %v581_v26 = vpop.f32.mrb[5].mxu0 }
 0x352   :  { %v435_v27 = vpop.f32.mrb[6].mxu0 }
 0x353   :  { %v440_v28 = vadd.f32 %v439_v25, %v432_v24  ;;  %v582_v29 = vpop.f32.mrb[7].mxu0 }
 0x355   :  { %v441_v30 = vrot.slane %v440_v28, 2 }
 0x357   :  { %v442_v31 = vadd.f32 %v441_v30, %v440_v28 }
 0x359   :  { %v443_v32 = vrot.slane %v442_v31, 1 }
 0x35b   :  { %v444_v33 = vadd.f32 %v443_v32, %v442_v31 }
 0x35d   :  { %v446_v34 = vmul.f32 0.125, %v444_v33 }
 0x35f   :  { %v447_v35 = vsub.f32 %v432_v24, %v446_v34 }
 0x361   :  { %v448_v36 = vmul.f32 %v447_v35, %v447_v35 }
 0x363   :  { %v449_v37 = vrot.slane %v448_v36, 4 }
 0x365   :  { %v450_v38 = vadd.f32 %v449_v37, %v448_v36 }
 0x367   :  { %v451_v41 = vrot.slane %v450_v38, 2 }
 0x369   :  { %v452_v42 = vadd.f32 %v451_v41, %v450_v38 }
 0x36b   :  { %v453_v43 = vrot.slane %v452_v42, 1 }
 0x36d   :  { %v454_v44 = vadd.f32 %v453_v43, %v452_v42 }
 0x36f   :  { %v455_v45 = vmul.f32 0.125, %v454_v44 }
 0x371   :  { %v456_v46 = vadd.f32 1e-05, %v455_v45 }
 0x373   :  { %616 = vrsqrt.f32 %v456_v46 }
 0x37d   :  { %v617_v48 = vpop.eup %616 }
 0x37e   :  { %v458_v49 = vmul.f32 %v617_v48, %v438_v47 }
 0x380   :  { %v462_v50 = vrot.slane %v458_v49, %v864_v39 }
 0x382   :  { %v463_v52 = vmul.f32 %v462_v50, %v447_v35 }
 0x384   :  { %v468_v53 = vadd.f32 %v467_v51, %v463_v52 }
 0x386   :  { %469 = vst [vmem:[#allocation11] sm:$0xff] %v468_v53 }
 0x387   :  { %717 = shalt.err (!%p714_p8)
}
 0x388   :  { %s718_s8 = scalar_lea.hbm %s906_s7, 128 }
 0x389   :  { %p719_p9 = scmp.ne.s32.totalorder %s906_s7, %s718_s8  ;;  %p722_p10 = scmp.lt.u32.totalorder %s718_s8, %s906_s7 }
 0x38b   :  { %p724_p11 = pnand %p722_p10, %p719_p9 }
 0x38d   :  { %727 = shalt.err (!%p724_p11)
}
 0x38e   :  { %479 = dma.vmem_to_hbm [thread:$0]  %s477_s28, 128, %s906_s7, [#allocation5]  }
 0x38f   :  { %734 = dma.done.wait [#allocation5], 128  }
 0x390   :  { %735 = vsyncadd [#allocation5], 4294967168 }
 0x391   :  { %483 = vsyncpa [#allocation4], 1 }
 0x392   :  { %484 = vsyncpa [#allocation7], 1 }
 0x393   :  { %485 = vsyncpa [#allocation10], 1 }
 0x394   :  { %486 = vsyncpa [#allocation5], 1 }

// kernel: tpu_custom_call.1
= control target key start
LH: loop header
LB: loop body
LE: loop exit
PB: predicated region body
PF: predicated region fallthrough
CT: control target
= control target key end

     0   :  { %12 = vsyncpa [#allocation4], 0  ;;  %s899_s0 = inlined_call_operand.hbm [shape: f32[8,64], index: 0, kind: input, shape index: {}]   ;;  %s900_s1 = inlined_call_operand.hbm [shape: bf16[64,128], index: 1, kind: input, shape index: {}]   ;;  %s901_s2 = inlined_call_operand.vmem [shape: f32[2,128], index: 2, kind: input, shape index: {}]   ;;  %s902_s3 = inlined_call_operand.hbm [shape: bf16[128,128], index: 3, kind: input, shape index: {}]   ;;  %s903_s4 = inlined_call_operand.vmem [shape: f32[2,128], index: 4, kind: input, shape index: {}]   ;;  %s904_s5 = inlined_call_operand.hbm [shape: bf16[128,128], index: 5, kind: input, shape index: {}]   ;;  %s905_s6 = inlined_call_operand.vmem [shape: f32[2,128], index: 6, kind: input, shape index: {}]   ;;  %s906_s7 = inlined_call_operand.hbm [shape: f32[8,128], index: 7, kind: output, shape index: {}]  }
   0x1   :  { %13 = vsyncpa [#allocation7], 0 }
   0x2   :  { %14 = vsyncpa [#allocation10], 0 }
   0x3   :  { %15 = vsyncpa [#allocation5], 0  ;;  %s736_s24 = smov [#allocation6]   ;;  %s618_s28 = scalar_lea.hbm %s900_s1, 512 }
   0x4   :  { %s31_s25 = sshll.u32 %s736_s24, 4  ;;  %p619_p0 = scmp.ne.s32.totalorder %s900_s1, %s618_s28  ;;  %s32_s25 = int_to_ptr.vmem [resolvable:$true] %s31_s25 }
   0x5   :  { %p622_p1 = scmp.lt.u32.totalorder %s618_s28, %s900_s1 }
   0x7   :  { %p624_p2 = pnand %p622_p1, %p619_p0 }
   0x9   :  { %627 = shalt.err (!%p624_p2)
}
   0xa   :  { %s628_s10 = scalar_lea.vmem %s32_s25, 512  ;;  %p633_p4 = scmp.lt.s32.totalorder %s32_s25, %s32_s25 }
   0xb   :  { %p629_p3 = scmp.ne.s32.totalorder %s32_s25, %s628_s10  ;;  %p634_p5 = scmp.lt.s32.totalorder %s628_s10, %s628_s10 }
   0xd   :  { %p635_p6 = por %p634_p5, %p633_p4 }
   0xf   :  { %p636_p7 = pnand %p635_p6, %p629_p3 }
  0x11   :  { %639 = shalt.err (!%p636_p7)
}
  0x12   :  { %s737_s11 = smov 64   ;;  %s738_s12 = smov 4  }
  0x13   :  { %37 = dma.hbm_to_vmem [thread:$0]  %s900_s1, 512, %s32_s25, [#allocation7], %s737_s11, %s737_s11, %s738_s12  }
  0x14   :  { %s739_s15 = smov [#allocation3]   ;;  %s740_s17 = smov [#allocation8]  }
  0x15   :  { %s22_s16 = sshll.u32 %s739_s15, 4  ;;  %s45_s18 = sshll.u32 %s740_s17, 4  ;;  %s23_s16 = int_to_ptr.vmem [resolvable:$true] %s22_s16  ;;  %s46_s18 = int_to_ptr.vmem [resolvable:$true] %s45_s18 }
  0x16   :  { %s640_s21 = scalar_lea.hbm %s899_s0, 128 }
  0x17   :  { %p641_p8 = scmp.ne.s32.totalorder %s899_s0, %s640_s21  ;;  %p644_p9 = scmp.lt.u32.totalorder %s640_s21, %s899_s0 }
  0x19   :  { %p646_p10 = pnand %p644_p9, %p641_p8 }
  0x1b   :  { %649 = shalt.err (!%p646_p10)
}
  0x1c   :  { %s650_s1 = scalar_lea.vmem %s23_s16, 128  ;;  %p655_p12 = scmp.lt.s32.totalorder %s23_s16, %s23_s16 }
  0x1d   :  { %p651_p11 = scmp.ne.s32.totalorder %s23_s16, %s650_s1  ;;  %p656_p13 = scmp.lt.s32.totalorder %s650_s1, %s650_s1 }
  0x1f   :  { %p657_p0 = por %p656_p13, %p655_p12 }
  0x21   :  { %p658_p1 = pnand %p657_p0, %p651_p11 }
  0x23   :  { %661 = shalt.err (!%p658_p1)
}
  0x24   :  { %25 = dma.hbm_to_vmem [thread:$0]  %s899_s0, 128, %s23_s16, [#allocation4]  }
  0x25   :  { %s662_s30 = scalar_lea.hbm %s902_s3, 1024 }
  0x26   :  { %p663_p2 = scmp.ne.s32.totalorder %s902_s3, %s662_s30  ;;  %p666_p3 = scmp.lt.u32.totalorder %s662_s30, %s902_s3 }
  0x28   :  { %p668_p4 = pnand %p666_p3, %p663_p2 }
  0x2a   :  { %671 = shalt.err (!%p668_p4)
}
  0x2b   :  { %s672_s14 = scalar_lea.vmem %s46_s18, 1024  ;;  %p677_p6 = scmp.lt.s32.totalorder %s46_s18, %s46_s18 }
  0x2c   :  { %p673_p5 = scmp.ne.s32.totalorder %s46_s18, %s672_s14  ;;  %p678_p7 = scmp.lt.s32.totalorder %s672_s14, %s672_s14 }
  0x2e   :  { %p679_p8 = por %p678_p7, %p677_p6 }
  0x30   :  { %p680_p9 = pnand %p679_p8, %p673_p5 }
  0x32   :  { %683 = shalt.err (!%p680_p9)
}
  0x33   :  { %51 = dma.hbm_to_vmem [thread:$0]  %s902_s3, 1024, %s46_s18, [#allocation7], %s737_s11, %s737_s11, %s738_s12  }
  0x34   :  { %s741_s16 = smov [#allocation9]   ;;  %s684_s21 = scalar_lea.hbm %s904_s5, 1024 }
  0x35   :  { %s59_s17 = sshll.u32 %s741_s16, 4  ;;  %p685_p10 = scmp.ne.s32.totalorder %s904_s5, %s684_s21  ;;  %s60_s17 = int_to_ptr.vmem [resolvable:$true] %s59_s17 }
  0x36   :  { %p688_p11 = scmp.lt.u32.totalorder %s684_s21, %s904_s5 }
  0x38   :  { %p690_p12 = pnand %p688_p11, %p685_p10 }
  0x3a   :  { %693 = shalt.err (!%p690_p12)
}
  0x3b   :  { %s694_s1 = scalar_lea.vmem %s60_s17, 1024  ;;  %p699_p0 = scmp.lt.s32.totalorder %s60_s17, %s60_s17 }
  0x3c   :  { %p695_p13 = scmp.ne.s32.totalorder %s60_s17, %s694_s1  ;;  %p700_p1 = scmp.lt.s32.totalorder %s694_s1, %s694_s1 }
  0x3e   :  { %p701_p2 = por %p700_p1, %p699_p0 }
  0x40   :  { %p702_p3 = pnand %p701_p2, %p695_p13 }
  0x42   :  { %705 = shalt.err (!%p702_p3)
}
  0x43   :  { %65 = dma.hbm_to_vmem [thread:$0]  %s904_s5, 1024, %s60_s17, [#allocation10], %s737_s11, %s737_s11, %s738_s12  }
  0x44   :  { %728 = dma.done.wait [#allocation4], 128  }
  0x45   :  { %729 = vsyncadd [#allocation4], 4294967168 }
  0x46   :  { %730 = dma.done.wait [#allocation7], 1536  }
  0x47   :  { %731 = vsyncadd [#allocation7], 4294965760 }
  0x48   :  { %732 = dma.done.wait [#allocation10], 1024  }
  0x49   :  { %733 = vsyncadd [#allocation10], 4294966272  ;;  %v742_v0 = vmov 0.0   ;;  %vm743_vm0 = vmmov 0   ;;  %v592_v1 = vld [vmem:[#allocation6] sm:$0xff]   ;;  %v593_v2 = vld [vmem:[#allocation6 + $0x8] sm:$0xff]   ;;  %v184_v36 = vlaneseq }
  0x4a   :  { %531 = vmatprep.subr.bf16.mxu0 %v742_v0  ;;  %539 = vmatprep.mubr.msk.bf16.mxu0 %vm743_vm0, %v742_v0  ;;  %v594_v3 = vld [vmem:[#allocation6 + $0x10] sm:$0xff]   ;;  %vm119_vm1 = vcmask 523264   ;;  %v595_v4 = vld [vmem:[#allocation6 + $0x18] sm:$0xff]   ;;  %v596_v7 = vld [vmem:[#allocation8] sm:$0xff]   ;;  %s744_s27 = smov [#allocation11]  }
  0x4b   :  { %543 = vmatprep.subr.bf16.mxu1 %v742_v0  ;;  %559 = vmatprep.mubr.msk.bf16.mxu1 %vm743_vm0, %v742_v0  ;;  %v85_v5 = vld [vmem:[#allocation3] sm:$0xff]  ;;  %v597_v8 = vld [vmem:[#allocation8 + $0x8] sm:$0xff]   ;;  %v598_v9 = vld [vmem:[#allocation8 + $0x10] sm:$0xff]   ;;  %v185_v37 = vshrl.u32 %v184_v36, 7  ;;  %s476_s28 = sshll.u32 %s744_s27, 4  ;;  %s477_s28 = int_to_ptr.vmem [resolvable:$true] %s476_s28 }
  0x4c   :  { %532 = vmatpush3.bf16.msra.mxu0 %v592_v1  ;;  %v94_v6 = vpack.c.bf16 %v85_v5, %v85_v5  ;;  %544 = vmatpush3.bf16.msra.mxu1 %v596_v7  ;;  %v599_v10 = vld [vmem:[#allocation8 + $0x18] sm:$0xff]   ;;  %v600_v11 = vld [vmem:[#allocation8 + $0x20] sm:$0xff]   ;;  %v601_v12 = vld [vmem:[#allocation8 + $0x28] sm:$0xff]   ;;  %s706_s29 = scalar_lea.vmem %s477_s28, 128  ;;  %p711_p5 = scmp.lt.s32.totalorder %s477_s28, %s477_s28 }
  0x4d   :  { %533 = vmatprep.subr.bf16.mxu0 %v742_v0  ;;  %545 = vmatprep.subr.bf16.mxu1 %v742_v0  ;;  %v602_v13 = vld [vmem:[#allocation8 + $0x30] sm:$0xff]   ;;  %v603_v14 = vld [vmem:[#allocation8 + $0x38] sm:$0xff]   ;;  %v864_v39 = vsub.s32 0, %v185_v37  ;;  %v866_v40 = vsub.s32 1, %v185_v37  ;;  %v604_v49 = vld [vmem:[#allocation9] sm:$0xff]   ;;  %p707_p4 = scmp.ne.s32.totalorder %s477_s28, %s706_s29  ;;  %p712_p6 = scmp.lt.s32.totalorder %s706_s29, %s706_s29 }
  0x4e   :  { %v163_v38 = vld [vmem:[%s901_s2] sm:$0x3]  ;;  %v605_v50 = vld [vmem:[#allocation9 + $0x8] sm:$0xff]   ;;  %v607_v52 = vld [vmem:[#allocation9 + $0x18] sm:$0xff]  }
  0x4f   :  { %v192_v44 = vrot.slane %v163_v38, %v866_v40  ;;  %v606_v51 = vld [vmem:[#allocation9 + $0x10] sm:$0xff]   ;;  %v608_v53 = vld [vmem:[#allocation9 + $0x20] sm:$0xff]   ;;  %v609_v54 = vld [vmem:[#allocation9 + $0x28] sm:$0xff]   ;;  %p713_p7 = por %p712_p6, %p711_p5 }
  0x50   :  { %534 = vmatpush3.bf16.msra.mxu0 %v593_v2  ;;  %546 = vmatpush3.bf16.msra.mxu1 %v597_v8  ;;  %v610_v55 = vld [vmem:[#allocation9 + $0x30] sm:$0xff]   ;;  %v611_v56 = vld [vmem:[#allocation9 + $0x38] sm:$0xff]  }
  0x51   :  { %535 = vmatprep.subr.bf16.mxu0 %v742_v0  ;;  %547 = vmatprep.subr.bf16.mxu1 %v742_v0  ;;  %p714_p8 = pnand %p713_p7, %p707_p4 }
  0x54   :  { %536 = vmatpush3.bf16.msra.mxu0 %v594_v3  ;;  %548 = vmatpush3.bf16.msra.mxu1 %v598_v9 }
  0x55   :  { %537 = vmatprep.subr.bf16.mxu0 %v742_v0  ;;  %549 = vmatprep.subr.bf16.mxu1 %v742_v0 }
  0x58   :  { %538 = vmatpush3.bf16.msra.mxu0 %v595_v4  ;;  %550 = vmatpush3.bf16.msra.mxu1 %v599_v10 }
  0x59   :  { %563 = vmatprep.subr.bf16.mxu0 %v742_v0  ;;  %551 = vmatprep.subr.bf16.mxu1 %v742_v0 }
  0x5b   :  { %540 = vmatmul.mubr.msk.bf16.vlgmr.msra.gmra.mrb[0].mxu0 %vm119_vm1, %v94_v6 }
  0x5c   :  { %579 = vmatprep.mubr.msk.bf16.mxu0 %vm743_vm0, %v742_v0  ;;  %552 = vmatpush3.bf16.msra.mxu1 %v600_v11 }
  0x5d   :  { %553 = vmatprep.subr.bf16.mxu1 %v742_v0  ;;  %564 = vmatpush3.bf16.msra.mxu0 %v604_v49 }
  0x5e   :  { %565 = vmatprep.subr.bf16.mxu0 %v742_v0 }
  0x60   :  { %554 = vmatpush3.bf16.msra.mxu1 %v601_v12 }
  0x61   :  { %555 = vmatprep.subr.bf16.mxu1 %v742_v0  ;;  %566 = vmatpush3.bf16.msra.mxu0 %v605_v50 }
  0x62   :  { %567 = vmatprep.subr.bf16.mxu0 %v742_v0 }
  0x64   :  { %556 = vmatpush3.bf16.msra.mxu1 %v602_v13 }
  0x65   :  { %557 = vmatprep.subr.bf16.mxu1 %v742_v0  ;;  %568 = vmatpush3.bf16.msra.mxu0 %v606_v51 }
  0x66   :  { %569 = vmatprep.subr.bf16.mxu0 %v742_v0 }
  0x68   :  { %558 = vmatpush3.bf16.msra.mxu1 %v603_v14  ;;  %v300_v14 = vld [vmem:[%s903_s4] sm:$0x3] }
  0x69   :  { %570 = vmatpush3.bf16.msra.mxu0 %v607_v52 }
  0x6a   :  { %571 = vmatprep.subr.bf16.mxu0 %v742_v0 }
  0x6d   :  { %572 = vmatpush3.bf16.msra.mxu0 %v608_v53 }
  0x6e   :  { %573 = vmatprep.subr.bf16.mxu0 %v742_v0 }
  0x71   :  { %574 = vmatpush3.bf16.msra.mxu0 %v609_v54 }
  0x72   :  { %575 = vmatprep.subr.bf16.mxu0 %v742_v0 }
  0x75   :  { %576 = vmatpush3.bf16.msra.mxu0 %v610_v55 }
  0x76   :  { %577 = vmatprep.subr.bf16.mxu0 %v742_v0 }
  0x79   :  { %578 = vmatpush3.bf16.msra.mxu0 %v611_v56 }
 0x12e   :  { %v157_v15 = vpop.f32.mrb[0].mxu0 }
 0x12f   :  { %v164_v16 = vrot.slane %v157_v15, 4  ;;  %v541_v17 = vpop.f32.mrb[1].mxu0 }
 0x130   :  { %v160_v18 = vpop.f32.mrb[2].mxu0 }
 0x131   :  { %v165_v19 = vadd.f32 %v164_v16, %v157_v15  ;;  %v542_v20 = vpop.f32.mrb[3].mxu0  ;;  %v328_v18 = vrot.slane %v300_v14, %v866_v40 }
 0x133   :  { %v166_v21 = vrot.slane %v165_v19, 2 }
 0x135   :  { %v167_v22 = vadd.f32 %v166_v21, %v165_v19 }
 0x137   :  { %v168_v23 = vrot.slane %v167_v22, 1 }
 0x139   :  { %v169_v24 = vadd.f32 %v168_v23, %v167_v22 }
 0x13b   :  { %v171_v25 = vmul.f32 0.125, %v169_v24 }
 0x13d   :  { %v172_v26 = vsub.f32 %v157_v15, %v171_v25 }
 0x13f   :  { %v173_v27 = vmul.f32 %v172_v26, %v172_v26 }
 0x141   :  { %v174_v28 = vrot.slane %v173_v27, 4 }
 0x143   :  { %v175_v29 = vadd.f32 %v174_v28, %v173_v27 }
 0x145   :  { %v176_v30 = vrot.slane %v175_v29, 2 }
 0x147   :  { %v177_v31 = vadd.f32 %v176_v30, %v175_v29 }
 0x149   :  { %v178_v32 = vrot.slane %v177_v31, 1 }
 0x14b   :  { %v179_v33 = vadd.f32 %v178_v32, %v177_v31 }
 0x14d   :  { %v180_v34 = vmul.f32 0.125, %v179_v33 }
 0x14f   :  { %v181_v35 = vadd.f32 1e-05, %v180_v34 }
 0x151   :  { %612 = vrsqrt.f32 %v181_v35 }
 0x15b   :  { %v613_v41 = vpop.eup %612 }
 0x15c   :  { %v183_v42 = vmul.f32 %v613_v41, %v163_v38 }
 0x15e   :  { %v187_v43 = vrot.slane %v183_v42, %v864_v39 }
 0x160   :  { %v188_v45 = vmul.f32 %v187_v43, %v172_v26 }
 0x162   :  { %v193_v46 = vadd.f32 %v192_v44, %v188_v45 }
 0x164   :  { %v194_v47 = vmax.f32 %v193_v46, 0.0 }
 0x166   :  { %v211_v48 = vpack.c.bf16 %v194_v47, %v194_v47  ;;  %v438_v47 = vld [vmem:[%s905_s6] sm:$0x3] }
 0x167   :  { %v467_v51 = vrot.slane %v438_v47, %v866_v40 }
 0x168   :  { %560 = vmatmul.mubr.bf16.vlgmr.msra.gmra.mrb[0].mxu1 %v211_v48 }
 0x23b   :  { %v294_v57 = vpop.f32.mrb[0].mxu1 }
 0x23c   :  { %v301_v58 = vrot.slane %v294_v57, 4  ;;  %v561_v59 = vpop.f32.mrb[1].mxu1 }
 0x23d   :  { %v297_v60 = vpop.f32.mrb[2].mxu1 }
 0x23e   :  { %v302_v61 = vadd.f32 %v301_v58, %v294_v57  ;;  %v562_v62 = vpop.f32.mrb[3].mxu1 }
 0x240   :  { %v303_v63 = vrot.slane %v302_v61, 2 }
 0x242   :  { %v304_v1 = vadd.f32 %v303_v63, %v302_v61 }
 0x244   :  { %v305_v2 = vrot.slane %v304_v1, 1 }
 0x246   :  { %v306_v3 = vadd.f32 %v305_v2, %v304_v1 }
 0x248   :  { %v307_v4 = vmul.f32 0.125, %v306_v3 }
 0x24a   :  { %v308_v5 = vsub.f32 %v294_v57, %v307_v4 }
 0x24c   :  { %v309_v6 = vmul.f32 %v308_v5, %v308_v5 }
 0x24e   :  { %v310_v7 = vrot.slane %v309_v6, 4 }
 0x250   :  { %v311_v8 = vadd.f32 %v310_v7, %v309_v6 }
 0x252   :  { %v312_v9 = vrot.slane %v311_v8, 2 }
 0x254   :  { %v313_v10 = vadd.f32 %v312_v9, %v311_v8 }
 0x256   :  { %v314_v11 = vrot.slane %v313_v10, 1 }
 0x258   :  { %v315_v0 = vadd.f32 %v314_v11, %v313_v10 }
 0x25a   :  { %v316_v12 = vmul.f32 0.125, %v315_v0 }
 0x25c   :  { %v317_v13 = vadd.f32 1e-05, %v316_v12 }
 0x25e   :  { %614 = vrsqrt.f32 %v317_v13 }
 0x268   :  { %v615_v15 = vpop.eup %614 }
 0x269   :  { %v319_v16 = vmul.f32 %v615_v15, %v300_v14 }
 0x26b   :  { %v323_v17 = vrot.slane %v319_v16, %v864_v39 }
 0x26d   :  { %v324_v19 = vmul.f32 %v323_v17, %v308_v5 }
 0x26f   :  { %v329_v20 = vadd.f32 %v328_v18, %v324_v19 }
 0x271   :  { %v330_v21 = vmax.f32 %v329_v20, 0.0 }
 0x273   :  { %v331_v22 = vpack.c.bf16 %v330_v21, %v330_v21 }
 0x275   :  { %332 = vst [vmem:[#allocation2] sm:$0xf] %v331_v22 }
 0x27c   :  { %v333_v23 = vld [vmem:[#allocation2] sm:$0xf] }
 0x27d   :  { %580 = vmatmul.mubr.bf16.vlgmr.msra.gmra.mrb[4].mxu0 %v333_v23 }
 0x350   :  { %v432_v24 = vpop.f32.mrb[4].mxu0 }
 0x351   :  { %v439_v25 = vrot.slane %v432_v24, 4  ;;  %v581_v26 = vpop.f32.mrb[5].mxu0 }
 0x352   :  { %v435_v27 = vpop.f32.mrb[6].mxu0 }
 0x353   :  { %v440_v28 = vadd.f32 %v439_v25, %v432_v24  ;;  %v582_v29 = vpop.f32.mrb[7].mxu0 }
 0x355   :  { %v441_v30 = vrot.slane %v440_v28, 2 }
 0x357   :  { %v442_v31 = vadd.f32 %v441_v30, %v440_v28 }
 0x359   :  { %v443_v32 = vrot.slane %v442_v31, 1 }
 0x35b   :  { %v444_v33 = vadd.f32 %v443_v32, %v442_v31 }
 0x35d   :  { %v446_v34 = vmul.f32 0.125, %v444_v33 }
 0x35f   :  { %v447_v35 = vsub.f32 %v432_v24, %v446_v34 }
 0x361   :  { %v448_v36 = vmul.f32 %v447_v35, %v447_v35 }
 0x363   :  { %v449_v37 = vrot.slane %v448_v36, 4 }
 0x365   :  { %v450_v38 = vadd.f32 %v449_v37, %v448_v36 }
 0x367   :  { %v451_v41 = vrot.slane %v450_v38, 2 }
 0x369   :  { %v452_v42 = vadd.f32 %v451_v41, %v450_v38 }
 0x36b   :  { %v453_v43 = vrot.slane %v452_v42, 1 }
 0x36d   :  { %v454_v44 = vadd.f32 %v453_v43, %v452_v42 }
 0x36f   :  { %v455_v45 = vmul.f32 0.125, %v454_v44 }
 0x371   :  { %v456_v46 = vadd.f32 1e-05, %v455_v45 }
 0x373   :  { %616 = vrsqrt.f32 %v456_v46 }
 0x37d   :  { %v617_v48 = vpop.eup %616 }
 0x37e   :  { %v458_v49 = vmul.f32 %v617_v48, %v438_v47 }
 0x380   :  { %v462_v50 = vrot.slane %v458_v49, %v864_v39 }
 0x382   :  { %v463_v52 = vmul.f32 %v462_v50, %v447_v35 }
 0x384   :  { %v468_v53 = vadd.f32 %v467_v51, %v463_v52 }
 0x386   :  { %469 = vst [vmem:[#allocation11] sm:$0xff] %v468_v53 }
 0x387   :  { %717 = shalt.err (!%p714_p8)
}
 0x388   :  { %s718_s8 = scalar_lea.hbm %s906_s7, 128 }
 0x389   :  { %p719_p9 = scmp.ne.s32.totalorder %s906_s7, %s718_s8  ;;  %p722_p10 = scmp.lt.u32.totalorder %s718_s8, %s906_s7 }
 0x38b   :  { %p724_p11 = pnand %p722_p10, %p719_p9 }
 0x38d   :  { %727 = shalt.err (!%p724_p11)
}
 0x38e   :  { %479 = dma.vmem_to_hbm [thread:$0]  %s477_s28, 128, %s906_s7, [#allocation5]  }
 0x38f   :  { %734 = dma.done.wait [#allocation5], 128  }
 0x390   :  { %735 = vsyncadd [#allocation5], 4294967168 }
 0x391   :  { %483 = vsyncpa [#allocation4], 1 }
 0x392   :  { %484 = vsyncpa [#allocation7], 1 }
 0x393   :  { %485 = vsyncpa [#allocation10], 1 }
 0x394   :  { %486 = vsyncpa [#allocation5], 1 }

</bundles_post_ra>
